<compile_context>
chip_gen: v5e
topology: v5e:2x2
jax: 0.10.0
libtpu: 0.0.40
codegen_flags: <defaults>
</compile_context>

<pallas_src>
import functools

import jax
import jax.numpy as jnp
from jax.experimental import pallas as pl
from jax.experimental.pallas import tpu as pltpu

_MIB = 1024 * 1024
_HIGHEST = jax.lax.Precision.HIGHEST


def _sublane_multiple(dtype):
    """Second-to-last-dim multiple: 8 (f32), 16 (bf16), 32 (int8/fp8)."""
    return max(8, 32 // jnp.dtype(dtype).itemsize)


# --------------------------------------------------------------------------
# Standalone intervention kernel (the hook math itself, optional fused tanh).
# --------------------------------------------------------------------------
def _icv_intervention_kernel(h_ref, shift_ref, o_ref, *, apply_tanh):
    """One (batch, seq-tile) block per grid step.

    h_ref:     (tS, D)  hidden-state tile (pre-activation if apply_tanh)
    shift_ref: (1, D)   ICV shift for this batch element (resident across the
                        sequence-tile grid axis)
    o_ref:     (tS, D)  output tile (aliased with the input HBM buffer)
    """
    x = h_ref[...]
    if apply_tanh:
        # Fused producer epilogue — saves one full HBM round trip.
        # TODO(synk): if a bundle dump on v5e shows VALU (not DMA) binding for
        # bf16 inputs, dispatch apply_tanh=False on that generation only.
        x = jnp.tanh(x)

    # All math in f32; lane reductions accumulated in f32 for accuracy.
    x32 = x.astype(jnp.float32)
    s32 = x32 + shift_ref[...].astype(jnp.float32)           # broadcast (1, D)

    h_norm_sq = jnp.sum(x32 * x32, axis=-1, keepdims=True)   # (tS, 1)
    s_norm_sq = jnp.sum(s32 * s32, axis=-1, keepdims=True)   # (tS, 1)

    # Single narrow (tS, 1) scale; sqrt / rsqrt live on the EUP slot.
    # NOTE: as in the PyTorch reference, an exactly-zero shifted row yields
    # inf/NaN (no epsilon) — intentional.
    scale = jnp.sqrt(h_norm_sq) * jax.lax.rsqrt(s_norm_sq)   # (tS, 1) f32

    # Rescale in f32 on the resident s32, then a single down-cast store.
    o_ref[...] = (s32 * scale).astype(o_ref.dtype)


def _choose_seq_tile(B, S, D, dtype,
                     vmem_budget_bytes=24 * _MIB,
                     max_tile_bytes=4 * _MIB,
                     min_grid_steps=8):
    """Pick sequence-tile rows for the streaming intervention kernel.

    Per tile element the VMEM cost is:
      * in + out native tiles, each double-buffered  -> 4 * itemsize bytes
      * ~4 full-width f32 in-kernel temporaries      -> 16 bytes
    Also: cap the native tile at ~4 MiB (more buys nothing on a mem-bound op),
    round rows to the dtype sublane multiple, and cap so B * n_s >= 8 grid
    steps (megacore balance on v7x + pipeline depth everywhere).
    """
    itemsize = jnp.dtype(dtype).itemsize
    sub = _sublane_multiple(dtype)

    bytes_per_row = D * (4 * itemsize + 4 * 4)                 # tiles + f32 temps
    t = max(sub, vmem_budget_bytes // max(bytes_per_row, 1))
    t = min(t, max(sub, max_tile_bytes // max(D * itemsize, 1)))
    t = min(t, S)

    # Megacore / pipeline-depth balance.
    steps_per_batch = -(-min_grid_steps // max(B, 1))          # ceil
    t = min(t, max(sub, -(-S // steps_per_batch)))             # ceil(S / steps)

    if t < S:
        t = max(sub, (t // sub) * sub)
    return min(t, S)


def _streaming_vmem_limit(tile_rows, D, dtype, n_f32_temps=4):
    itemsize = jnp.dtype(dtype).itemsize
    footprint = (4 * tile_rows * D * itemsize          # in/out, double-buffered
                 + n_f32_temps * tile_rows * D * 4     # f32 temporaries
                 + 2 * D * itemsize)                   # shift
    return int(max(32 * _MIB, min(48 * _MIB, footprint * 1.25)))


@functools.partial(jax.jit, static_argnames=("seq_tile", "apply_tanh"))
def icv_intervention(hidden_states, shift, *, seq_tile=None, apply_tanh=False):
    """Apply (optional fused tanh) + ICV shift + renormalization.

    hidden_states: [B, S, D]  (pre-activation if apply_tanh=True)
    shift:         [B, D]     (already indexed by layer_to_icv_index)
    returns:       [B, S, D]  same dtype as hidden_states
    """
    B, S, D = hidden_states.shape
    dtype = hidden_states.dtype
    itemsize = jnp.dtype(dtype).itemsize

    tS = seq_tile if seq_tile is not None else _choose_seq_tile(B, S, D, dtype)
    tS = min(tS, S)
    n_s = pl.cdiv(S, tS)

    # [B, D] -> [B, 1, D]: metadata-only reshape, lane-dense (1, D) view.
    shift3 = shift.reshape(B, 1, D)

    kernel = functools.partial(_icv_intervention_kernel, apply_tanh=apply_tanh)

    cost = pl.CostEstimate(
        flops=6 * B * S * D,
        transcendentals=(B * S * D if apply_tanh else 0) + 2 * B * S,
        bytes_accessed=(2 * B * S * D + B * D) * itemsize,
    )

    return pl.pallas_call(
        kernel,
        out_shape=jax.ShapeDtypeStruct((B, S, D), dtype),
        grid=(B, n_s),  # S axis last: shift block index invariant across it
        in_specs=[
            pl.BlockSpec((None, tS, D), lambda b, s: (b, s, 0)),
            pl.BlockSpec((None, 1, D), lambda b, s: (b, 0, 0)),
        ],
        out_specs=pl.BlockSpec((None, tS, D), lambda b, s: (b, s, 0)),
        input_output_aliases={0: 0},  # reuse the hidden-state HBM buffer
        cost_estimate=cost,
        compiler_params=pltpu.CompilerParams(
            dimension_semantics=("parallel", "parallel"),
            vmem_limit_bytes=_streaming_vmem_limit(tS, D, dtype),
        ),
    )(hidden_states, shift3)


# --------------------------------------------------------------------------
# Fused producer: tiled matmul whose finalize step applies tanh + shift +
# renorm on the resident (tm, D) output tile.  Removes the standalone pass
# over [B, S, D] entirely for intervened layers.
# --------------------------------------------------------------------------
def _fused_layer_icv_kernel(h_ref, w_ref, shift_ref, o_ref, acc_ref):
    k = pl.program_id(2)

    @pl.when(k == 0)
    def _():
        acc_ref[...] = jnp.zeros_like(acc_ref)

    acc_ref[...] += jnp.dot(h_ref[...], w_ref[...],
                            precision=_HIGHEST,
                            preferred_element_type=jnp.float32)

    @pl.when(k == pl.num_programs(2) - 1)
    def _():
        x32 = jnp.tanh(acc_ref[...])                          # (tm, D) f32
        s32 = x32 + shift_ref[...].astype(jnp.float32)        # broadcast (1, D)
        h_norm_sq = jnp.sum(x32 * x32, axis=-1, keepdims=True)
        s_norm_sq = jnp.sum(s32 * s32, axis=-1, keepdims=True)
        scale = jnp.sqrt(h_norm_sq) * jax.lax.rsqrt(s_norm_sq)
        o_ref[...] = (s32 * scale).astype(o_ref.dtype)


def _choose_matmul_tiles(S, Din, Dout, dtype, vmem_budget_bytes=24 * _MIB):
    itemsize = jnp.dtype(dtype).itemsize
    sub = _sublane_multiple(dtype)
    tk = Din if Din <= 512 else 512                       # lane-aligned (mult of 128)

    out_row_bytes = Dout * (4 + 2 * itemsize + 3 * 4)     # acc + 2x out + f32 temps
    lhs_row_bytes = 2 * tk * itemsize                     # lhs, double-buffered
    w_bytes = 2 * tk * Dout * itemsize                    # rhs, double-buffered
    avail = max(vmem_budget_bytes - w_bytes, sub * (out_row_bytes + lhs_row_bytes))

    tm = max(sub, avail // max(out_row_bytes + lhs_row_bytes, 1))
    tm = min(tm, 256, S)
    if tm < S:
        tm = max(sub, (tm // sub) * sub)
    return tm, tk


def _matmul_vmem_limit(tm, tk, Dout, dtype):
    itemsize = jnp.dtype(dtype).itemsize
    footprint = (2 * tm * tk * itemsize        # lhs, double-buffered
                 + 2 * tk * Dout * itemsize    # rhs, double-buffered
                 + 2 * tm * Dout * itemsize    # out, double-buffered
                 + tm * Dout * 4               # f32 accumulator scratch
                 + 3 * tm * Dout * 4           # finalize f32 temporaries
                 + 2 * Dout * itemsize)        # shift
    return int(max(32 * _MIB, min(48 * _MIB, footprint * 1.25)))


@jax.jit
def fused_layer_with_icv(h, w, shift):
    """out = renorm(tanh(h @ w) + shift), fused into the matmul epilogue.

    h:     [B, S, Din]
    w:     [Din, Dout]
    shift: [B, Dout]
    """
    B, S, Din = h.shape
    Dout = w.shape[1]
    dtype = h.dtype
    itemsize = jnp.dtype(dtype).itemsize

    tm, tk = _choose_matmul_tiles(S, Din, Dout, dtype)
    n_m = pl.cdiv(S, tm)
    n_k = pl.cdiv(Din, tk)

    shift3 = shift.reshape(B, 1, Dout)

    cost = pl.CostEstimate(
        flops=2 * B * S * Din * Dout + 8 * B * S * Dout,
        transcendentals=B * S * Dout + 2 * B * S,
        bytes_accessed=(B * S * Din + B * S * Dout + B * Dout
                        + B * n_m * Din * Dout) * itemsize,
    )

    return pl.pallas_call(
        _fused_layer_icv_kernel,
        out_shape=jax.ShapeDtypeStruct((B, S, Dout), dtype),
        grid=(B, n_m, n_k),  # reduction axis last; output tile resident over k
        in_specs=[
            pl.BlockSpec((None, tm, tk), lambda b, m, k: (b, m, k)),
            pl.BlockSpec((tk, Dout), lambda b, m, k: (k, 0)),
            pl.BlockSpec((None, 1, Dout), lambda b, m, k: (b, 0, 0)),
        ],
        out_specs=pl.BlockSpec((None, tm, Dout), lambda b, m, k: (b, m, 0)),
        scratch_shapes=[pltpu.VMEM((tm, Dout), jnp.float32)],
        cost_estimate=cost,
        compiler_params=pltpu.CompilerParams(
            dimension_semantics=("parallel", "parallel", "arbitrary"),
            vmem_limit_bytes=_matmul_vmem_limit(tm, tk, Dout, dtype),
        ),
    )(h, w, shift3)


# --------------------------------------------------------------------------
# JAX analogue of LearnableICVInterventionLMM around a toy dense+tanh stack.
# --------------------------------------------------------------------------
class LearnableICVInterventionLMMJax:
    """After each layer whose index is in `intervention_layers`, the ICV
    intervention is applied to its hidden states — equivalent to the
    TraceDict edit_output hook.  For intervened layers the whole
    tanh + shift + renorm is fused into the producing matmul's epilogue."""
    # TODO(synk): in a real LMM the fusion point is the transformer-block
    # epilogue (its last projection matmul); here the toy dense layer stands in.

    def __init__(self, layer_weights, intervention_layers, total_layers,
                 enable_intervention=True):
        self.layer_weights = layer_weights            # list of [D, D]
        self.total_layers = total_layers
        self.intervention_layers = self._prepare_layers(intervention_layers)
        self.layer_to_icv_index = {
            int(layer_id): int(icv_idx)
            for icv_idx, layer_id in enumerate(self.intervention_layers)
        }
        self.intervention_enabled = enable_intervention

    def _prepare_layers(self, layers):
        if layers == -1:
            return list(range(self.total_layers))
        return [layers] if isinstance(layers, int) else layers

    def toggle_intervention(self, enable: bool):
        self.intervention_enabled = bool(enable)

    def __call__(self, x, icv=None):
        # x: [B, S, D], icv: [B, num_icv, D]
        h = x
        for layer_idx, w in enumerate(self.layer_weights):
            intervene = (self.intervention_enabled
                         and icv is not None
                         and layer_idx in self.layer_to_icv_index)
            if intervene:
                shift = icv[:, self.layer_to_icv_index[layer_idx], :]   # [B, D]
                h = fused_layer_with_icv(h, w, shift)     # matmul-epilogue fusion
            else:
                h = jnp.tanh(jnp.matmul(h, w, precision=_HIGHEST))
        return h


# --------------------------------------------------------------------------
# Pure-JAX references.
# --------------------------------------------------------------------------
def _reference_intervention(h, shift):
    shifted = h + shift[:, None, :]
    h_norm = jnp.linalg.norm(h, axis=-1, keepdims=True)
    s_norm = jnp.linalg.norm(shifted, axis=-1, keepdims=True)
    return shifted / s_norm * h_norm


def _reference_model(x, icv, layer_weights, layer_to_icv_index,
                     enable_intervention=True):
    h = x
    for i, w in enumerate(layer_weights):
        h = jnp.tanh(jnp.matmul(h, w, precision=_HIGHEST))
        if enable_intervention and i in layer_to_icv_index:
            h = _reference_intervention(h, icv[:, layer_to_icv_index[i], :])
    return h


if __name__ == "__main__":
    key = jax.random.PRNGKey(0)
    B, S, D = 2, 8, 32
    total_layers = 4
    intervention_layers = [1, 3]
    num_icv = len(intervention_layers)

    k_x, k_icv, *k_ws = jax.random.split(key, 2 + total_layers)

    x = jax.random.normal(k_x, (B, S, D), dtype=jnp.float32)
    icv = 0.1 * jax.random.normal(k_icv, (B, num_icv, D), dtype=jnp.float32)
    layer_weights = [
        (1.0 / jnp.sqrt(D)) * jax.random.normal(k, (D, D), dtype=jnp.float32)
        for k in k_ws
    ]

    # Check 1: standalone hook kernel (small, full-block path) vs reference.
    h_small = jax.random.normal(jax.random.PRNGKey(1), (B, S, D), jnp.float32)
    shift_small = icv[:, 0, :]
    got = jax.block_until_ready(icv_intervention(h_small, shift_small))
    want = _reference_intervention(h_small, shift_small)
    assert jnp.allclose(got, want, atol=1e-5, rtol=1e-5), "small kernel mismatch"

    # Check 2: standalone hook kernel, tiled path with partial last tile
    # (exercises seq tiling, sublane rounding, megacore-balance cap).
    B2, S2, D2 = 1, 1000, 256
    h_big = jax.random.normal(jax.random.PRNGKey(2), (B2, S2, D2), jnp.float32)
    shift_big = 0.1 * jax.random.normal(jax.random.PRNGKey(3), (B2, D2), jnp.float32)
    got_big = jax.block_until_ready(icv_intervention(h_big, shift_big))
    want_big = _reference_intervention(h_big, shift_big)
    assert jnp.allclose(got_big, want_big, atol=1e-4, rtol=1e-4), "tiled kernel mismatch"

    # Check 3: bf16 tiled path (16-row sublane multiple), loose tolerance.
    h_bf16 = h_big.astype(jnp.bfloat16)
    shift_bf16 = shift_big.astype(jnp.bfloat16)
    got_bf16 = jax.block_until_ready(icv_intervention(h_bf16, shift_bf16))
    want_bf16 = _reference_intervention(h_bf16.astype(jnp.float32),
                                        shift_bf16.astype(jnp.float32))
    assert jnp.all(jnp.isfinite(got_bf16.astype(jnp.float32))), "bf16 non-finite"
    assert jnp.allclose(got_bf16.astype(jnp.float32), want_bf16,
                        atol=5e-2, rtol=5e-2), "bf16 kernel mismatch"

    # Check 4: full model with matmul-epilogue-fused intervention vs reference.
    model = LearnableICVInterventionLMMJax(
        layer_weights,
        intervention_layers=intervention_layers,
        total_layers=total_layers,
        enable_intervention=True,
    )
    out = jax.block_until_ready(model(x, icv=icv))
    assert out.shape == (B, S, D)
    want_model = _reference_model(x, icv, layer_weights, model.layer_to_icv_index)
    assert jnp.allclose(out, want_model, atol=5e-3, rtol=5e-3), "model mismatch"

    print("KERNEL_OK")
</pallas_src>

<mosaic_0001>
module attributes {stable_mosaic.version = 11 : i64} {
  func.func @_icv_intervention_kernel(%arg0: i32, %arg1: i32, %arg2: memref<1x8x32xf32, #tpu.memory_space<vmem>>, %arg3: memref<1x1x32xf32, #tpu.memory_space<vmem>>, %arg4: memref<1x8x32xf32, #tpu.memory_space<vmem>>) attributes {dimension_semantics = [#tpu.dimension_semantics<parallel>, #tpu.dimension_semantics<parallel>], iteration_bounds = array<i64: 2, 1>, scalar_prefetch = 0 : i64, scratch_operands = 0 : i64, tpu.core_type = #tpu.core_type<tc>, window_params = [{transform_indices = @transform_0, window_bounds = array<i64: 1, 8, 32>}, {transform_indices = @transform_1, window_bounds = array<i64: 1, 1, 32>}, {transform_indices = @transform_2, window_bounds = array<i64: 1, 8, 32>}]} {
    %c0 = arith.constant 0 : index
    %c0_0 = arith.constant 0 : index
    %c0_1 = arith.constant 0 : index
    %0 = vector.load %arg2[%c0, %c0_0, %c0_1] : memref<1x8x32xf32, #tpu.memory_space<vmem>>, vector<1x8x32xf32>
    %1 = vector.shape_cast %0 : vector<1x8x32xf32> to vector<8x32xf32>
    %c0_2 = arith.constant 0 : index
    %c0_3 = arith.constant 0 : index
    %c0_4 = arith.constant 0 : index
    %2 = vector.load %arg3[%c0_2, %c0_3, %c0_4] : memref<1x1x32xf32, #tpu.memory_space<vmem>>, vector<1x1x32xf32>
    %3 = vector.shape_cast %2 : vector<1x1x32xf32> to vector<1x32xf32>
    %4 = vector.broadcast %3 : vector<1x32xf32> to vector<8x32xf32>
    %5 = arith.addf %1, %4 : vector<8x32xf32>
    %6 = arith.mulf %1, %1 : vector<8x32xf32>
    %cst = arith.constant dense<0.000000e+00> : vector<8xf32>
    %7 = vector.multi_reduction <add>, %6, %cst [1] : vector<8x32xf32> to vector<8xf32>
    %8 = vector.shape_cast %7 : vector<8xf32> to vector<8x1xf32>
    %9 = arith.mulf %5, %5 : vector<8x32xf32>
    %cst_5 = arith.constant dense<0.000000e+00> : vector<8xf32>
    %10 = vector.multi_reduction <add>, %9, %cst_5 [1] : vector<8x32xf32> to vector<8xf32>
    %11 = vector.shape_cast %10 : vector<8xf32> to vector<8x1xf32>
    %12 = math.sqrt %8 : vector<8x1xf32>
    %13 = math.rsqrt %11 : vector<8x1xf32>
    %14 = arith.mulf %12, %13 : vector<8x1xf32>
    %15 = vector.broadcast %14 : vector<8x1xf32> to vector<8x32xf32>
    %16 = arith.mulf %5, %15 : vector<8x32xf32>
    %c0_6 = arith.constant 0 : index
    %c0_7 = arith.constant 0 : index
    %c0_8 = arith.constant 0 : index
    %17 = vector.load %arg4[%c0_6, %c0_7, %c0_8] : memref<1x8x32xf32, #tpu.memory_space<vmem>>, vector<1x8x32xf32>
    %18 = vector.shape_cast %17 : vector<1x8x32xf32> to vector<8x32xf32>
    %19 = vector.shape_cast %16 : vector<8x32xf32> to vector<1x8x32xf32>
    tpu.vector_store %arg4[%c0_6, %c0_7, %c0_8], %19 {strides = array<i32>} : memref<1x8x32xf32, #tpu.memory_space<vmem>>, vector<1x8x32xf32>,
    return
  }
  func.func @transform_0(%arg0: i32, %arg1: i32) -> (i32, i32, i32) {
    %c0_i32 = arith.constant 0 : i32
    %c0_i32_0 = arith.constant 0 : i32
    return %arg0, %arg1, %c0_i32 : i32, i32, i32
  }
  func.func @transform_1(%arg0: i32, %arg1: i32) -> (i32, i32, i32) {
    %c0_i32 = arith.constant 0 : i32
    %c0_i32_0 = arith.constant 0 : i32
    %c0_i32_1 = arith.constant 0 : i32
    return %arg0, %c0_i32, %c0_i32_0 : i32, i32, i32
  }
  func.func @transform_2(%arg0: i32, %arg1: i32) -> (i32, i32, i32) {
    %c0_i32 = arith.constant 0 : i32
    %c0_i32_0 = arith.constant 0 : i32
    return %arg0, %arg1, %c0_i32 : i32, i32, i32
  }
}

</mosaic_0001>

<bundles_post_ra>
// kernel: icv_intervention.1
= control target key start
LH: loop header
LB: loop body
LE: loop exit
PB: predicated region body
PF: predicated region fallthrough
CT: control target
= control target key end

     0   :  { %7 = vsyncpa [#allocation3], 0  ;;  %s679_s0 = inlined_call_operand.hbm [shape: f32[2,8,32], index: 0, kind: input, shape index: {}, may-alias: {0,2}]   ;;  %s680_s1 = inlined_call_operand.vmem [shape: f32[2,1,32], index: 1, kind: input, shape index: {}]   ;;  %s681_s2 = inlined_call_operand.hbm [shape: f32[2,8,32], index: 2, kind: output, shape index: {}, may-alias: {0,2}]  }
   0x1   :  { %9 = vsyncpa [#allocation3 + $0x1], 0 }
   0x2   :  { %10 = vsyncpa [#allocation4], 0 }
   0x3   :  { %12 = vsyncpa [#allocation4 + $0x1], 0  ;;  %s547_s9 = smov 0   ;;  %s549_s10 = smov 0  }
   0x4   :  { %s551_s11 = smov 0   ;;  %s553_s12 = smov 0  }
   0x5   :  { %s555_s13 = smov 0   ;;  %s557_s14 = smov 0  }
   0x6 LB: > { %s338_s15 = sadd.s32 4294967295, %s530_s14   ;;  %s339_s16 = sadd.s32 4294967294, %s530_s14   ;;  %s530_s14 = sphi %s557_s14, %s18_s14   ;;  %s526_s13 = sphi %s555_s13, %s690_s13   ;;  %s522_s12 = sphi %s553_s12, %s689_s12   ;;  %s518_s11 = sphi %s551_s11, %s688_s11   ;;  %s514_s10 = sphi %s549_s10, %s687_s10   ;;  %s510_s9 = sphi %s547_s9, %s686_s9  }
   0x7   : > { %s30_s17 = sadd.s32 1, %s526_s13  ;;  %s39_s18 = sadd.s32 1, %s518_s11 }
   0x8   : > { %p32_p0 = scmp.ge.s32.totalorder %s30_s17, 2  ;;  %p46_p1 = scmp.ne.s32.totalorder %s518_s11, %s514_s10 }
   0x9   : > { %p47_p2 = scmp.eq.s32.totalorder %s530_s14, 0  ;;  %p52_p3 = scmp.ne.s32.totalorder %s514_s10, %s510_s9 }
   0xa   : > { %s692_s17 = smov (%p32_p0, %s30_s17), 0  ;;  %p53_p5 = scmp.eq.s32.totalorder %s338_s15, 0 }
   0xb   : > { %p588_p4 = por %p47_p2, %p46_p1  ;;  %s34_s20 = ssub.s32 %s526_s13, %s692_s17 }
   0xc   : > { %p104_p6 = scmp.eq.s32.totalorder %s338_s15, 1  ;;  %p37_p7 = scmp.eq.s32.totalorder %s34_s20, 0 }
   0xd   : > { %p594_p8 = por %p53_p5, %p52_p3  ;;  %p110_p10 = scmp.eq.s32.totalorder %s339_s16, 1 }
   0xe   : > { %p598_p9 = por %p104_p6, %p46_p1  ;;  %p341_p12 = scmp.ge.s32.totalorder %s530_s14, 2 }
   0xf   : > { %s603_s23 = scalar_select %p37_p7, %s518_s11, %s39_s18  }
  0x10   : > { %p605_p11 = por %p110_p10, %p52_p3  ;;  %p363_p13 = scmp.lt.s32.totalorder %s530_s14, 2 }
  0x11   : > { %s130_s25 = sand.u32 1, %s518_s11   ;;  %s343_s27 = sshll.u32 %s526_s13, 3 }
  0x12   : > { %s342_s26 = sshll.u32 %s130_s25, 3  ;;  %s139_s30 = scalar_lea.hbm %s679_s0, %s343_s27 }
  0x13   : > { %s134_s3 = scalar_lea.vmem [#allocation2], %s342_s26  ;;  %s141_s5 = sshll.u32 %s139_s30, 4  ;;  %s142_s5 = int_to_ptr.hbm [resolvable:$true] %s141_s5 }
  0x14   : > { %s143_s4 = sshll.u32 %s134_s3, 4  ;;  %p356_p0 = pnand %p363_p13, %p588_p4  ;;  %s144_s4 = int_to_ptr.vmem [resolvable:$true] %s143_s4 }
  0x15   : > { %p344_p1 = scmp.ge.s32.totalorder %s530_s14, 1  ;;  %p154_p2 = scmp.lt.s32.totalorder %s530_s14, 3 }
  0x16   : > { %s131_s6 = scalar_lea.sflag [#allocation3], %s130_s25 }
  0x17   : > { %358 = dma.hbm_to_vmem [thread:$0]  (!%p356_p0), %s142_s5, 128, %s144_s4, %s131_s6  }
  0x18   : > { %p155_p3 = pnand %p344_p1, %p154_p2 }
  0x19   : > { %s621_s7 = sand.u32 (!%p155_p3), 1, %s514_s10  }
  0x1a   : > { %158 = sbr.rel (%p155_p3) target bundleno = 185 (0xb9), region = 28  ;;  %s345_s8 = sshll.u32 (!%p155_p3), %s621_s7, 3 }
  0x1b   : > { %s161_s15 = scalar_lea.sflag (!%p155_p3), [#allocation3], %s621_s7  ;;  %s164_s16 = scalar_lea.vmem (!%p155_p3), [#allocation2], %s345_s8 }
  0x1f   : > { %501 = dma.done.wait (%p594_p8), %s161_s15, 128  }
  0x20   : > { %503 = vsyncadd (%p594_p8), %s161_s15, 4294967168  ;;  %p189_p4 = scmp.lt.s32.totalorder %s522_s12, 1  ;;  %v192_v0 = vld [vmem:[%s164_s16] sm:$0xff]  ;;  %vm199_vm0 = vcmask 261120   ;;  %s348_s21 = sshll.u32 %s522_s12, 3 }
  0x21   : > { %v198_v2 = vmul.f32 %v192_v0, %v192_v0  ;;  %s244_s28 = scalar_lea.hbm %s681_s2, %s348_s21  ;;  %s188_s29 = scalar_lea.vmem [#allocation5], %s345_s8 }
  0x22   : > { %s190_s18 = scalar_select %p189_p4, %s522_s12, 1 }
  0x23   : > { %v200_v4 = vsel %vm199_vm0, %v198_v2, 0.0  ;;  %s246_s12 = sshll.u32 %s188_s29, 4  ;;  %s248_s30 = sshll.u32 %s244_s28, 4  ;;  %s247_s12 = int_to_ptr.vmem [resolvable:$true] %s246_s12  ;;  %s249_s30 = int_to_ptr.hbm [resolvable:$true] %s248_s30 }
  0x24   : > { %s191_s25 = scalar_lea.vmem %s680_s1, %s190_s18  ;;  %201 = vadd.xlane.f32.xlu0 %v200_v4  ;;  %s233_s3 = scalar_lea.sflag [#allocation4], %s621_s7 }
  0x25   : > { %v413_v1 = vld [vmem:[%s191_s25] ss:$0 sm:$0xff]  ;;  %s462_s4 = sshra.s32 %s249_s30, 4  ;;  %s468_s8 = scalar_lea.hbm %s681_s2, 16  ;;  %s463_s4 = int_to_ptr.hbm [resolvable:$true] %s462_s4 }
  0x26   : > { %v197_v3 = vadd.f32 %v413_v1, %v192_v0  ;;  %s464_s5 = scalar_lea.hbm %s463_s4, 8  ;;  %p469_p8 = scmp.lt.s32.totalorder %s463_s4, %s681_s2 }
  0x27   : > { %p465_p5 = scmp.ne.s32.totalorder %s463_s4, %s464_s5  ;;  %p470_p10 = scmp.lt.s32.totalorder %s468_s8, %s464_s5 }
  0x28   : > { %v203_v5 = vmul.f32 %v197_v3, %v197_v3 }
  0x29   : > { %p466_p6 = pnand %p465_p5, %p598_p9  ;;  %p471_p13 = por %p470_p10, %p469_p8 }
  0x2a   : > { %v204_v6 = vsel %vm199_vm0, %v203_v5, 0.0 }
  0x2b   : > { %p467_p7 = pneg %p466_p6 }
  0x2c   : > { %205 = vadd.xlane.f32.xlu0 %v204_v6 }
  0x2d   : > { %p472_p0 = pnand %p471_p13, %p467_p7 }
  0x97   : > { %v202_v7 = vpop.xlane.xlu0 %201 }
  0x98   : > { %414 = vrsqrt.f32 %v202_v7  ;;  %vm214_vm1 = vcmp.eq.f32.partialorder %v202_v7, inf  ;;  %v217_v22 = vand.u32 2147483648, %v202_v7  ;;  %vm216_vm4 = vcmp.eq.f32.partialorder %v202_v7, 0.0 }
  0x9e   : > { %v415_v8 = vpop.eup %414 }
  0x9f   : > { %v208_v9 = vmul.f32 %v415_v8, %v202_v7  ;;  %v206_v10 = vpop.xlane.xlu0 %205 }
  0xa0   : > { %416 = vrsqrt.f32 %v206_v10  ;;  %vm225_vm3 = vweird.f32 %v206_v10 }
  0xa1   : > { %v209_v11 = vmul.f32 %v415_v8, %v208_v9 }
  0xa3   : > { %v210_v12 = vmul.f32 0.5, %v209_v11 }
  0xa5   : > { %v211_v13 = vsub.f32 1.5, %v210_v12 }
  0xa6   : > { %v417_v14 = vpop.eup %416 }
  0xa7   : > { %v212_v15 = vmul.f32 %v415_v8, %v211_v13  ;;  %v220_v16 = vmul.f32 %v417_v14, %v206_v10  ;;  %vm226_vm2 = vweird.f32 %v417_v14 }
  0xa8   : > { %vm227_vm5 = vmor %vm225_vm3, %vm226_vm2 }
  0xa9   : > { %v221_v17 = vmul.f32 %v417_v14, %v220_v16  ;;  %v213_v18 = vmul.f32 %v212_v15, %v202_v7 }
  0xab   : > { %v222_v19 = vmul.f32 0.5, %v221_v17  ;;  %v215_v21 = vsel %vm214_vm1, %v202_v7, %v213_v18 }
  0xac   : > { %v218_v24 = vsel %vm216_vm4, %v217_v22, %v215_v21 }
  0xad   : > { %v223_v20 = vsub.f32 1.5, %v222_v19 }
  0xaf   : > { %v224_v23 = vmul.f32 %v417_v14, %v223_v20 }
  0xb1   : > { %v228_v25 = vsel %vm227_vm5, %v417_v14, %v224_v23 }
  0xb2   : > { %v229_v26 = vmul.f32 %v228_v25, %v218_v24 }
  0xb4   : > { %v230_v27 = vmul.f32 %v229_v26, %v197_v3 }
  0xb6   : > { %231 = vst.msk [vmem:[%s188_s29] sm:$0xff] %vm199_vm0, %v230_v27 }
  0xb7   : > { %475 = shalt.err (!%p472_p0)
}
  0xb8   : > { %353 = dma.vmem_to_hbm [thread:$0]  (%p598_p9), %s247_s12, 128, %s249_s30, %s233_s3  }
  0xb9 PF: > { %s260_s7 = sand.u32 1, %s510_s9   ;;  %p360_p1 = pnand %p341_p12, %p605_p11 }
  0xba   : > { %s261_s19 = scalar_lea.sflag [#allocation4], %s260_s7 }
  0xbb   : > { %p361_p2 = pneg %p360_p1 }
  0xbd   : > { %505 = dma.done.wait (%p361_p2), %s261_s19, 128  }
  0xbe   : > { %507 = vsyncadd (%p361_p2), %s261_s19, 4294967168  ;;  %s18_s14 = sadd.s32 1, %s530_s14   ;;  %s686_s9 = smov %s514_s10 }
  0xbf   : > { %p15_p3 = scmp.ge.s32.totalorder %s18_s14, 4   ;;  %s687_s10 = smov %s518_s11 }
  0xc0   : > { %s688_s11 = smov %s603_s23  ;;  %s689_s12 = smov %s526_s13 }
  0xc1   : > { %s690_s13 = smov %s692_s17  ;;  %17 = sbr.rel (!%p15_p3) target bundleno = 6 (0x6), region = 76 }
  0xc6   :  { %267 = vsyncpa [#allocation3], 1 }
  0xc7   :  { %269 = vsyncpa [#allocation3 + $0x1], 1 }
  0xc8   :  { %270 = vsyncpa [#allocation4], 1 }
  0xc9   :  { %272 = vsyncpa [#allocation4 + $0x1], 1 }

</bundles_post_ra>
